<compile_context>
chip_gen: v6e
topology: v6e:2x2x1
jax: 0.10.0
libtpu: 0.0.40
codegen_flags: <defaults>
</compile_context>

<pallas_src>
import functools
import numpy as np

import jax
import jax.numpy as jnp
from jax import lax
from jax.experimental import pallas as pl
from jax.experimental.pallas import tpu as pltpu

NUM_CLASSES = 8


# --------------------------------------------------------------------------
# In-kernel math helpers
# --------------------------------------------------------------------------
def _erf(x):
    # Abramowitz & Stegun 7.1.26 polynomial erf approximation (|err| < 1.5e-7)
    ax = jnp.abs(x)
    t = 1.0 / (1.0 + 0.3275911 * ax)
    poly = t * (0.254829592 + t * (-0.284496736 + t * (1.421413741
             + t * (-1.453152027 + t * 1.061405429))))
    y = 1.0 - poly * jnp.exp(-ax * ax)
    return jnp.where(x >= 0, y, -y)


def _gelu(x):
    return 0.5 * x * (1.0 + _erf(x * 0.7071067811865476))


def _sigmoid(x):
    return 1.0 / (1.0 + jnp.exp(-x))


# number of extra refs each epilogue op consumes
_OP_NREFS = {"relu": 0, "gelu": 0, "sigmoid": 0, "bn": 2, "add": 1,
             "mul": 1, "add_x": 0}


# --------------------------------------------------------------------------
# Pallas kernels
# --------------------------------------------------------------------------
def _mm_fused_kernel(n_pairs, pre_ln, ops, *refs):
    """Fused matmul: acc = sum_k x_k @ w_k + b, with optional LayerNorm prologue
    on x_0 and a chain of epilogue ops (relu/gelu/sigmoid/bn/add/mul/add_x)."""
    idx = 0
    xs = refs[idx:idx + n_pairs]; idx += n_pairs
    ws = refs[idx:idx + n_pairs]; idx += n_pairs
    b_ref = refs[idx]; idx += 1
    if pre_ln:
        g_ref, beta_ref = refs[idx], refs[idx + 1]; idx += 2
    op_refs = []
    for op in ops:
        n = _OP_NREFS[op]
        op_refs.append(refs[idx:idx + n]); idx += n
    o_ref = refs[idx]

    x0 = xs[0][...]
    if pre_ln:
        mu = jnp.mean(x0, axis=-1, keepdims=True)
        xc = x0 - mu
        var = jnp.mean(xc * xc, axis=-1, keepdims=True)      # biased (PyTorch LN)
        xin = xc * lax.rsqrt(var + 1e-5) * g_ref[...] + beta_ref[...]
    else:
        xin = x0

    acc = jnp.dot(xin.astype(jnp.bfloat16), ws[0][...].astype(jnp.bfloat16),
                  preferred_element_type=jnp.float32)
    for xr, wr in zip(xs[1:], ws[1:]):
        acc = acc + jnp.dot(xr[...].astype(jnp.bfloat16),
                            wr[...].astype(jnp.bfloat16),
                            preferred_element_type=jnp.float32)
    acc = acc + b_ref[...]

    for op, er in zip(ops, op_refs):
        if op == "relu":
            acc = jnp.maximum(acc, 0.0)
        elif op == "gelu":
            acc = _gelu(acc)
        elif op == "sigmoid":
            acc = _sigmoid(acc)
        elif op == "bn":
            acc = acc * er[0][...] + er[1][...]
        elif op == "add":
            acc = acc + er[0][...]
        elif op == "mul":
            acc = acc * er[0][...]
        elif op == "add_x":
            acc = acc + x0
    o_ref[...] = acc.astype(o_ref.dtype)


def _layernorm_kernel(x_ref, g_ref, b_ref, o_ref):
    x = x_ref[...]
    mu = jnp.mean(x, axis=-1, keepdims=True)
    xc = x - mu
    var = jnp.mean(xc * xc, axis=-1, keepdims=True)
    o_ref[...] = xc * lax.rsqrt(var + 1e-5) * g_ref[...] + b_ref[...]


def _gab_kernel(x_ref, w1_ref, b1_ref, w2_ref, b2_ref, o_ref):
    # x: (B, HW, C).  Whole GAB block in one body: global avg-pool, two gate
    # 1x1 convs (M = B is tiny -> keep f32), sigmoid, channel + spatial gating.
    x = x_ref[...]
    pooled = jnp.mean(x, axis=1)                                        # (B, C)
    g = jnp.dot(pooled, w1_ref[...], preferred_element_type=jnp.float32) + b1_ref[...]
    g = _gelu(jnp.maximum(g, 0.0))
    g = jnp.dot(g, w2_ref[...], preferred_element_type=jnp.float32) + b2_ref[...]
    g = _sigmoid(jnp.maximum(g, 0.0))
    ca = x * g[:, None, :]
    m = jnp.mean(ca, axis=-1, keepdims=True)
    o_ref[...] = ca * _sigmoid(m)


def _pairmax_kernel(x_ref, o_ref):          # (M, 2, N) -> (M, N)
    o_ref[...] = jnp.max(x_ref[...], axis=1)


def _pool_fc_kernel(x_ref, w_ref, b_ref, o_ref):   # (B, L, C) -> (B, NUM_CLASSES)
    pooled = jnp.mean(x_ref[...], axis=1)
    o_ref[...] = jnp.dot(pooled, w_ref[...],
                         preferred_element_type=jnp.float32) + b_ref[...]


# --------------------------------------------------------------------------
# pallas_call builders
# --------------------------------------------------------------------------
def _mm_fused_call(xs, ws, b, ln, extras, ops):
    """xs: tuple of (M, K_k); ws: tuple of (K_k, N); b: (1, N);
    ln: None or (gamma(1,K0), beta(1,K0)); extras: flat tuple of refs consumed
    by ops in order ((1,N) per-channel or (M,N) full)."""
    n_pairs = len(xs)
    M = xs[0].shape[0]
    N = ws[0].shape[1]
    TM = 128 if (M % 128 == 0 and M >= 128) else M
    grid = (M // TM,)

    arrays = list(xs) + list(ws) + [b]
    in_specs = ([pl.BlockSpec((TM, x.shape[1]), lambda i: (i, 0)) for x in xs]
                + [pl.BlockSpec(w.shape, lambda i: (0, 0)) for w in ws]
                + [pl.BlockSpec((1, N), lambda i: (0, 0))])

    pre_ln = ln is not None
    if pre_ln:
        K0 = xs[0].shape[1]
        arrays += [ln[0], ln[1]]
        in_specs += [pl.BlockSpec((1, K0), lambda i: (0, 0)),
                     pl.BlockSpec((1, K0), lambda i: (0, 0))]

    ei = 0
    for op in ops:
        for _ in range(_OP_NREFS[op]):
            e = extras[ei]; ei += 1
            arrays.append(e)
            if e.shape[0] == 1:
                in_specs.append(pl.BlockSpec((1, e.shape[1]), lambda i: (0, 0)))
            else:
                in_specs.append(pl.BlockSpec((TM, e.shape[1]), lambda i: (i, 0)))

    return pl.pallas_call(
        functools.partial(_mm_fused_kernel, n_pairs, pre_ln, tuple(ops)),
        out_shape=jax.ShapeDtypeStruct((M, N), jnp.float32),
        grid=grid,
        in_specs=in_specs,
        out_specs=pl.BlockSpec((TM, N), lambda i: (i, 0)),
        compiler_params=pltpu.CompilerParams(dimension_semantics=("parallel",)),
    )(*arrays)


def _im2col(x, *, stride=1, dilation=1, ksize=3):
    """Same-padded 3x3 im2col -> (B*Ho*Wo, 9*C), tap-major (ky,kx,c)."""
    B, H, W, C = x.shape
    pad = (ksize - 1) * dilation // 2
    xp = jnp.pad(x, ((0, 0), (pad, pad), (pad, pad), (0, 0)))
    Ho = (H + 2 * pad - dilation * (ksize - 1) - 1) // stride + 1
    Wo = (W + 2 * pad - dilation * (ksize - 1) - 1) // stride + 1
    cols = []
    for ky in range(ksize):
        for kx in range(ksize):
            y0 = ky * dilation
            x0 = kx * dilation
            cols.append(xp[:, y0:y0 + stride * (Ho - 1) + 1:stride,
                           x0:x0 + stride * (Wo - 1) + 1:stride, :])
    patches = jnp.concatenate(cols, axis=-1)
    return patches.reshape(B * Ho * Wo, ksize * ksize * C), Ho, Wo


# --------------------------------------------------------------------------
# Jitted op wrappers (glue + pallas_call).  Static config passed by keyword.
# --------------------------------------------------------------------------
@functools.partial(jax.jit, static_argnames=("ops",))
def conv1x1(xs, ws, b, ln, op_args, *, ops=()):
    """Fused 1x1 conv: y = ops( sum_k xs_k @ ws_k + b ) over NHWC inputs."""
    B, H, W = xs[0].shape[0], xs[0].shape[1], xs[0].shape[2]
    M = B * H * W
    N = ws[0].shape[1]
    xs2 = tuple(x.reshape(M, x.shape[3]) for x in xs)
    flat = []
    ai = 0
    for op in ops:
        for _ in range(_OP_NREFS[op]):
            e = op_args[ai]; ai += 1
            flat.append(e if (e.ndim == 2 and e.shape[0] == 1) else e.reshape(M, N))
    y = _mm_fused_call(xs2, ws, b, ln, tuple(flat), ops)
    return y.reshape(B, H, W, N)


@functools.partial(jax.jit, static_argnames=("ops", "dilation"))
def dwsep_conv(x, wfull, b, *, ops=(), dilation=1):
    """Depthwise-3x3 (+dilation) + pointwise 1x1 + folded BN + activation as a
    single fused im2col matmul (weight = rank-1 full-conv expansion)."""
    B = x.shape[0]
    patches, Ho, Wo = _im2col(x, stride=1, dilation=dilation)
    y = _mm_fused_call((patches,), (wfull,), b, None, (), ops)
    return y.reshape(B, Ho, Wo, wfull.shape[1])


@functools.partial(jax.jit, static_argnames=("stride",))
def stem_conv(x, w, b, scale, shift, *, stride=1):
    """3x3 conv (im2col matmul) + ReLU + BN(scale,shift) + GELU fused."""
    B = x.shape[0]
    patches, Ho, Wo = _im2col(x, stride=stride, dilation=1)
    y = _mm_fused_call((patches,), (w,), b, None, (scale, shift),
                       ("relu", "bn", "gelu"))
    return y.reshape(B, Ho, Wo, w.shape[1])


@jax.jit
def layernorm4d(x, gamma, beta):
    B, H, W, C = x.shape
    M = B * H * W
    TM = 128 if (M % 128 == 0 and M >= 128) else M
    y = pl.pallas_call(
        _layernorm_kernel,
        out_shape=jax.ShapeDtypeStruct((M, C), jnp.float32),
        grid=(M // TM,),
        in_specs=[pl.BlockSpec((TM, C), lambda i: (i, 0)),
                  pl.BlockSpec((1, C), lambda i: (0, 0)),
                  pl.BlockSpec((1, C), lambda i: (0, 0))],
        out_specs=pl.BlockSpec((TM, C), lambda i: (i, 0)),
        compiler_params=pltpu.CompilerParams(dimension_semantics=("parallel",)),
    )(x.reshape(M, C), gamma, beta)
    return y.reshape(B, H, W, C)


@jax.jit
def gab(x, w1, b1, w2, b2):
    B, H, W, C = x.shape
    y = pl.pallas_call(
        _gab_kernel,
        out_shape=jax.ShapeDtypeStruct((B, H * W, C), jnp.float32),
    )(x.reshape(B, H * W, C), w1, b1, w2, b2)
    return y.reshape(B, H, W, C)


@jax.jit
def maxpool2x2(x):
    B, H, W, C = x.shape
    H2, W2 = H // 2, W // 2
    # W-pair max then H-pair max; both use pure (row-major preserving) reshapes.
    a = pl.pallas_call(
        _pairmax_kernel,
        out_shape=jax.ShapeDtypeStruct((B * H * W2, C), jnp.float32),
    )(x.reshape(B * H * W2, 2, C))
    b = pl.pallas_call(
        _pairmax_kernel,
        out_shape=jax.ShapeDtypeStruct((B * H2, W2 * C), jnp.float32),
    )(a.reshape(B * H2, 2, W2 * C))
    return b.reshape(B, H2, W2, C)


@jax.jit
def pool_fc(x, w, b):
    B, H, W, C = x.shape
    return pl.pallas_call(
        _pool_fc_kernel,
        out_shape=jax.ShapeDtypeStruct((B, w.shape[1]), jnp.float32),
    )(x.reshape(B, H * W, C), w, b)


# --------------------------------------------------------------------------
# Module-level forward composition (plain Python between jitted wrappers)
# --------------------------------------------------------------------------
def defconv_fwd(p, x):
    fltr = p["conv2"]["w"].shape[1]
    # conv1 (with bn1 folded) and conv_residual share input x -> one matmul.
    hr = conv1x1((x,), (p["conv1res"]["w"],), p["conv1res"]["b"], None, (),
                 ops=("relu", "gelu"))
    h, r = hr[..., :fltr], hr[..., fltr:]
    # MSConv: three fused dwsep(+BN) kernels + one 3-input 1x1 conv (no concat).
    a = dwsep_conv(h, p["ms_dw1"]["w"], p["ms_dw1"]["b"], ops=(), dilation=1)
    bm = dwsep_conv(a, p["ms_dw2"]["w"], p["ms_dw2"]["b"], ops=(), dilation=1)
    c = dwsep_conv(bm, p["ms_dw3"]["w"], p["ms_dw3"]["b"], ops=(), dilation=1)
    z = conv1x1((a, bm, c),
                (p["ms_conv"]["w1"], p["ms_conv"]["w2"], p["ms_conv"]["w3"]),
                p["ms_conv"]["b"], None, (), ops=("relu", "gelu"))
    g = gab(z, p["gab"]["w1"], p["gab"]["b1"], p["gab"]["w2"], p["gab"]["b2"])
    # conv2 + residual add fused in the epilogue.
    return conv1x1((g,), (p["conv2"]["w"],), p["conv2"]["b"], None, (r,),
                   ops=("relu", "gelu", "add"))


def transenc_fwd(p, x, nl):
    for _ in range(nl):                       # same weights reused, as in the reference
        residual = x
        xn = layernorm4d(x, p["ln1_g"], p["ln1_b"])
        x1 = dwsep_conv(xn, p["lka_dw1"]["w"], p["lka_dw1"]["b"],
                        ops=("gelu",), dilation=1)
        x2 = dwsep_conv(x1, p["lka_dw2"]["w"], p["lka_dw2"]["b"],
                        ops=("gelu",), dilation=3)
        # LKA 1x1 conv + gating multiply by xn + residual add, all fused.
        x = conv1x1((x2,), (p["lka_conv"]["w"],), p["lka_conv"]["b"], None,
                    (xn, residual), ops=("relu", "gelu", "mul", "add"))
        # LayerNorm2 prologue + 1x1 conv + relu/gelu + residual add, all fused.
        x = conv1x1((x,), (p["trans_conv"]["w"],), p["trans_conv"]["b"],
                    (p["ln2_g"], p["ln2_b"]), (), ops=("relu", "gelu", "add_x"))
    return x


def block_fwd(p, x):
    return transenc_fwd(p, defconv_fwd(p, x), p["nl"])


def stem_fwd(p, x):
    h = stem_conv(x, p["c1_w"], p["c1_b"], p["bn1_s"], p["bn1_t"], stride=2)
    return stem_conv(h, p["c2_w"], p["c2_b"], p["bn2_s"], p["bn2_t"], stride=1)


def defvit_forward(params, x):
    h = stem_fwd(params["stem"], x)
    for stage in params["stages"]:
        for blk in stage:
            h = block_fwd(blk, h)
        h = maxpool2x2(h)
    return pool_fc(h, params["fc"]["w"], params["fc"]["b"])


# --------------------------------------------------------------------------
# Deterministic parameter initialization (weights created directly in folded,
# kernel-friendly layouts; matmul weights stored in bf16).
# --------------------------------------------------------------------------
class KeyGen:
    def __init__(self, seed):
        self.key = jax.random.PRNGKey(seed)

    def __call__(self):
        self.key, k = jax.random.split(self.key)
        return k


def _bf16(x):
    return x.astype(jnp.bfloat16)


def _bn_fold(kg, c):
    gamma = 1.0 + 0.1 * jax.random.normal(kg(), (c,), jnp.float32)
    beta = 0.1 * jax.random.normal(kg(), (c,), jnp.float32)
    mean = 0.1 * jax.random.normal(kg(), (c,), jnp.float32)
    var = 1.0 + 0.1 * jnp.abs(jax.random.normal(kg(), (c,), jnp.float32))
    s = gamma / jnp.sqrt(var + 1e-5)
    t = beta - mean * s
    return s, t


def init_conv1x1_w(kg, cin, cout):
    return jax.random.normal(kg(), (cin, cout), jnp.float32) * (1.0 / np.sqrt(cin))


def init_dwsep_bn(kg, cin, cout):
    # dwsep followed by BN: full-conv weight W[(t,c),o] = dw[t,c]*pw[c,o],
    # then BN folded into output columns (scale) and bias (shift).
    dw = jax.random.normal(kg(), (3, 3, cin), jnp.float32) * (1.0 / 3.0)
    pw = jax.random.normal(kg(), (cin, cout), jnp.float32) * (1.0 / np.sqrt(cin))
    s, t = _bn_fold(kg, cout)
    wfull = (dw[:, :, :, None] * pw[None, None, :, :]).reshape(9 * cin, cout)
    return {"w": _bf16(wfull * s[None, :]), "b": t.reshape(1, cout)}


def init_ln(kg, c):
    g = 1.0 + 0.1 * jax.random.normal(kg(), (c,), jnp.float32)
    b = 0.1 * jax.random.normal(kg(), (c,), jnp.float32)
    return g.reshape(1, c), b.reshape(1, c)


def init_block(kg, cin, fltr, nl):
    # DefConv.bn1 folded into conv1; conv1 & conv_residual merged column-wise.
    s1, t1 = _bn_fold(kg, cin)
    w1 = init_conv1x1_w(kg, cin, fltr)
    wr = init_conv1x1_w(kg, cin, fltr)
    w1f = s1[:, None] * w1
    b1f = (t1 @ w1).reshape(1, fltr)
    conv1res = {"w": _bf16(jnp.concatenate([w1f, wr], axis=1)),
                "b": jnp.concatenate([b1f, jnp.zeros((1, fltr), jnp.float32)], axis=1)}
    msw = init_conv1x1_w(kg, 3 * fltr, fltr)
    zeros = jnp.zeros((1, fltr), jnp.float32)
    ln1_g, ln1_b = init_ln(kg, fltr)
    ln2_g, ln2_b = init_ln(kg, fltr)
    return {
        "nl": nl,
        "conv1res": conv1res,
        "ms_dw1": init_dwsep_bn(kg, fltr, fltr),
        "ms_dw2": init_dwsep_bn(kg, fltr, fltr),
        "ms_dw3": init_dwsep_bn(kg, fltr, fltr),
        "ms_conv": {"w1": _bf16(msw[:fltr]), "w2": _bf16(msw[fltr:2 * fltr]),
                    "w3": _bf16(msw[2 * fltr:]), "b": zeros},
        "gab": {"w1": init_conv1x1_w(kg, fltr, fltr), "b1": zeros,
                "w2": init_conv1x1_w(kg, fltr, fltr), "b2": zeros},
        "conv2": {"w": _bf16(init_conv1x1_w(kg, fltr, fltr)), "b": zeros},
        "ln1_g": ln1_g, "ln1_b": ln1_b, "ln2_g": ln2_g, "ln2_b": ln2_b,
        "lka_dw1": init_dwsep_bn(kg, fltr, fltr),
        "lka_dw2": init_dwsep_bn(kg, fltr, fltr),
        "lka_conv": {"w": _bf16(init_conv1x1_w(kg, fltr, fltr)), "b": zeros},
        "trans_conv": {"w": _bf16(init_conv1x1_w(kg, fltr, fltr)), "b": zeros},
    }


def init_stem(kg):
    w1 = jax.random.normal(kg(), (3, 3, 3, 32), jnp.float32) * (1.0 / np.sqrt(27.0))
    s1, t1 = _bn_fold(kg, 32)
    w2 = jax.random.normal(kg(), (3, 3, 32, 32), jnp.float32) * (1.0 / np.sqrt(288.0))
    s2, t2 = _bn_fold(kg, 32)
    z = jnp.zeros((1, 32), jnp.float32)
    return {"c1_w": _bf16(w1.reshape(27, 32)), "c1_b": z,
            "bn1_s": s1.reshape(1, 32), "bn1_t": t1.reshape(1, 32),
            "c2_w": _bf16(w2.reshape(288, 32)), "c2_b": z,
            "bn2_s": s2.reshape(1, 32), "bn2_t": t2.reshape(1, 32)}


def init_defvit(kg, num_classes):
    cfg = [
        [(32, 32, 2), (32, 32, 2)],                                        # stage 1
        [(32, 64, 2), (64, 64, 2)],                                        # stage 2
        [(64, 128, 4)] + [(128, 128, 4)] * 4,                              # stage 3
        [(128, 128, 2), (128, 128, 2)],                                    # stage 4
    ]
    params = {"stem": init_stem(kg)}
    params["stages"] = [[init_block(kg, cin, f, nl) for (cin, f, nl) in stage]
                        for stage in cfg]
    params["fc"] = {
        "w": jax.random.normal(kg(), (128, num_classes), jnp.float32) / np.sqrt(128.0),
        "b": 0.01 * jax.random.normal(kg(), (1, num_classes), jnp.float32),
    }
    return params


# --------------------------------------------------------------------------
if __name__ == "__main__":
    # PyTorch-style NCHW input; 32x32 is the smallest spatial size that survives
    # the stem stride-2 conv plus four 2x2 max-pools (32 -> 16 -> 8 -> 4 -> 2 -> 1).
    x_nchw = jax.random.normal(jax.random.PRNGKey(0), (2, 3, 32, 32), jnp.float32)
    x_nhwc = jnp.transpose(x_nchw, (0, 2, 3, 1))     # convert to kernel layout NHWC

    params = init_defvit(KeyGen(1), NUM_CLASSES)

    logits = defvit_forward(params, x_nhwc)
    logits = jax.block_until_ready(logits)

    assert logits.shape == (2, NUM_CLASSES), logits.shape
    assert bool(jnp.all(jnp.isfinite(logits)))
    print("KERNEL_OK")
</pallas_src>

<mosaic_0001>
module attributes {stable_mosaic.version = 11 : i64} {
  func.func @_mm_fused_kernel(%arg0: i32, %arg1: memref<128x27xf32, #tpu.memory_space<vmem>>, %arg2: memref<27x32xbf16, #tpu.memory_space<vmem>>, %arg3: memref<1x32xf32, #tpu.memory_space<vmem>>, %arg4: memref<1x32xf32, #tpu.memory_space<vmem>>, %arg5: memref<1x32xf32, #tpu.memory_space<vmem>>, %arg6: memref<128x32xf32, #tpu.memory_space<vmem>>) attributes {dimension_semantics = [#tpu.dimension_semantics<parallel>], iteration_bounds = array<i64: 4>, scalar_prefetch = 0 : i64, scratch_operands = 0 : i64, tpu.core_type = #tpu.core_type<tc>, window_params = [{transform_indices = @transform_0, window_bounds = array<i64: 128, 27>}, {pipeline_mode = #tpu.pipeline_mode<synchronous>, transform_indices = @transform_1, window_bounds = array<i64: 27, 32>}, {pipeline_mode = #tpu.pipeline_mode<synchronous>, transform_indices = @transform_2, window_bounds = array<i64: 1, 32>}, {pipeline_mode = #tpu.pipeline_mode<synchronous>, transform_indices = @transform_3, window_bounds = array<i64: 1, 32>}, {pipeline_mode = #tpu.pipeline_mode<synchronous>, transform_indices = @transform_4, window_bounds = array<i64: 1, 32>}, {transform_indices = @transform_5, window_bounds = array<i64: 128, 32>}]} {
    %c0 = arith.constant 0 : index
    %c0_0 = arith.constant 0 : index
    %0 = vector.load %arg1[%c0, %c0_0] : memref<128x27xf32, #tpu.memory_space<vmem>>, vector<128x27xf32>
    %1 = arith.truncf %0 : vector<128x27xf32> to vector<128x27xbf16>
    %c0_1 = arith.constant 0 : index
    %c0_2 = arith.constant 0 : index
    %2 = vector.load %arg2[%c0_1, %c0_2] : memref<27x32xbf16, #tpu.memory_space<vmem>>, vector<27x32xbf16>
    %cst = arith.constant dense<0.000000e+00> : vector<128x32xf32>
    %3 = tpu.matmul %1, %2, %cst {dimension_numbers = #tpu.dot_dimension_numbers<[1], [0], [0], [1], [0, 0, 1, 1], [], []>} : vector<128x27xbf16>, vector<27x32xbf16>, vector<128x32xf32> -> vector<128x32xf32>
    %c0_3 = arith.constant 0 : index
    %c0_4 = arith.constant 0 : index
    %4 = vector.load %arg3[%c0_3, %c0_4] : memref<1x32xf32, #tpu.memory_space<vmem>>, vector<1x32xf32>
    %5 = vector.broadcast %4 : vector<1x32xf32> to vector<128x32xf32>
    %6 = arith.addf %3, %5 : vector<128x32xf32>
    %cst_5 = arith.constant 0.000000e+00 : f32
    %7 = vector.broadcast %cst_5 : f32 to vector<128x32xf32>
    %8 = arith.maximumf %6, %7 : vector<128x32xf32>
    %c0_6 = arith.constant 0 : index
    %c0_7 = arith.constant 0 : index
    %9 = vector.load %arg4[%c0_6, %c0_7] : memref<1x32xf32, #tpu.memory_space<vmem>>, vector<1x32xf32>
    %10 = vector.broadcast %9 : vector<1x32xf32> to vector<128x32xf32>
    %11 = arith.mulf %8, %10 : vector<128x32xf32>
    %c0_8 = arith.constant 0 : index
    %c0_9 = arith.constant 0 : index
    %12 = vector.load %arg5[%c0_8, %c0_9] : memref<1x32xf32, #tpu.memory_space<vmem>>, vector<1x32xf32>
    %13 = vector.broadcast %12 : vector<1x32xf32> to vector<128x32xf32>
    %14 = arith.addf %11, %13 : vector<128x32xf32>
    %cst_10 = arith.constant 5.000000e-01 : f32
    %15 = vector.broadcast %cst_10 : f32 to vector<128x32xf32>
    %16 = arith.mulf %15, %14 : vector<128x32xf32>
    %cst_11 = arith.constant 0.707106769 : f32
    %17 = vector.broadcast %cst_11 : f32 to vector<128x32xf32>
    %18 = arith.mulf %14, %17 : vector<128x32xf32>
    %19 = math.absf %18 : vector<128x32xf32>
    %cst_12 = arith.constant 0.327591091 : f32
    %20 = vector.broadcast %cst_12 : f32 to vector<128x32xf32>
    %21 = arith.mulf %20, %19 : vector<128x32xf32>
    %cst_13 = arith.constant 1.000000e+00 : f32
    %22 = vector.broadcast %cst_13 : f32 to vector<128x32xf32>
    %23 = arith.addf %22, %21 : vector<128x32xf32>
    %cst_14 = arith.constant 1.000000e+00 : f32
    %24 = vector.broadcast %cst_14 : f32 to vector<128x32xf32>
    %25 = arith.divf %24, %23 : vector<128x32xf32>
    %cst_15 = arith.constant 1.06140542 : f32
    %26 = vector.broadcast %cst_15 : f32 to vector<128x32xf32>
    %27 = arith.mulf %25, %26 : vector<128x32xf32>
    %cst_16 = arith.constant -1.45315206 : f32
    %28 = vector.broadcast %cst_16 : f32 to vector<128x32xf32>
    %29 = arith.addf %28, %27 : vector<128x32xf32>
    %30 = arith.mulf %25, %29 : vector<128x32xf32>
    %cst_17 = arith.constant 1.42141378 : f32
    %31 = vector.broadcast %cst_17 : f32 to vector<128x32xf32>
    %32 = arith.addf %31, %30 : vector<128x32xf32>
    %33 = arith.mulf %25, %32 : vector<128x32xf32>
    %cst_18 = arith.constant -0.284496725 : f32
    %34 = vector.broadcast %cst_18 : f32 to vector<128x32xf32>
    %35 = arith.addf %34, %33 : vector<128x32xf32>
    %36 = arith.mulf %25, %35 : vector<128x32xf32>
    %cst_19 = arith.constant 0.254829586 : f32
    %37 = vector.broadcast %cst_19 : f32 to vector<128x32xf32>
    %38 = arith.addf %37, %36 : vector<128x32xf32>
    %39 = arith.mulf %25, %38 : vector<128x32xf32>
    %cst_20 = arith.constant 0.000000e+00 : f32
    %40 = vector.broadcast %cst_20 : f32 to vector<128x32xf32>
    %41 = arith.subf %40, %19 : vector<128x32xf32>
    %42 = arith.mulf %41, %19 : vector<128x32xf32>
    %43 = math.exp %42 : vector<128x32xf32>
    %44 = arith.mulf %39, %43 : vector<128x32xf32>
    %cst_21 = arith.constant 1.000000e+00 : f32
    %45 = vector.broadcast %cst_21 : f32 to vector<128x32xf32>
    %46 = arith.subf %45, %44 : vector<128x32xf32>
    %cst_22 = arith.constant 0.000000e+00 : f32
    %47 = vector.broadcast %cst_22 : f32 to vector<128x32xf32>
    %48 = arith.cmpf oge, %18, %47 : vector<128x32xf32>
    %cst_23 = arith.constant 0.000000e+00 : f32
    %49 = vector.broadcast %cst_23 : f32 to vector<128x32xf32>
    %50 = arith.subf %49, %46 : vector<128x32xf32>
    %51 = arith.select %48, %46, %50 : vector<128x32xi1>, vector<128x32xf32>
    %cst_24 = arith.constant 1.000000e+00 : f32
    %52 = vector.broadcast %cst_24 : f32 to vector<128x32xf32>
    %53 = arith.addf %52, %51 : vector<128x32xf32>
    %54 = arith.mulf %16, %53 : vector<128x32xf32>
    %c0_25 = arith.constant 0 : index
    %c0_26 = arith.constant 0 : index
    %55 = vector.load %arg6[%c0_25, %c0_26] : memref<128x32xf32, #tpu.memory_space<vmem>>, vector<128x32xf32>
    tpu.vector_store %arg6[%c0_25, %c0_26], %54 {strides = array<i32>} : memref<128x32xf32, #tpu.memory_space<vmem>>, vector<128x32xf32>,
    return
  }
  func.func @transform_0(%arg0: i32) -> (i32, i32) {
    %c0_i32 = arith.constant 0 : i32
    %c0_i32_0 = arith.constant 0 : i32
    return %arg0, %c0_i32 : i32, i32
  }
  func.func @transform_1(%arg0: i32) -> (i32, i32) {
    %c0_i32 = arith.constant 0 : i32
    %c0_i32_0 = arith.constant 0 : i32
    %c0_i32_1 = arith.constant 0 : i32
    return %c0_i32, %c0_i32_0 : i32, i32
  }
  func.func @transform_2(%arg0: i32) -> (i32, i32) {
    %c0_i32 = arith.constant 0 : i32
    %c0_i32_0 = arith.constant 0 : i32
    %c0_i32_1 = arith.constant 0 : i32
    return %c0_i32, %c0_i32_0 : i32, i32
  }
  func.func @transform_3(%arg0: i32) -> (i32, i32) {
    %c0_i32 = arith.constant 0 : i32
    %c0_i32_0 = arith.constant 0 : i32
    %c0_i32_1 = arith.constant 0 : i32
    return %c0_i32, %c0_i32_0 : i32, i32
  }
  func.func @transform_4(%arg0: i32) -> (i32, i32) {
    %c0_i32 = arith.constant 0 : i32
    %c0_i32_0 = arith.constant 0 : i32
    %c0_i32_1 = arith.constant 0 : i32
    return %c0_i32, %c0_i32_0 : i32, i32
  }
  func.func @transform_5(%arg0: i32) -> (i32, i32) {
    %c0_i32 = arith.constant 0 : i32
    %c0_i32_0 = arith.constant 0 : i32
    return %arg0, %c0_i32 : i32, i32
  }
}

</mosaic_0001>

<bundles_post_ra>
// kernel: stem_conv.1
= control target key start
LH: loop header
LB: loop body
LE: loop exit
PB: predicated region body
PF: predicated region fallthrough
CT: control target
= control target key end

     0   :  { %10 = vsyncpa [#allocation3], 0  ;;  %s1725_s0 = inlined_call_operand.vmem [shape: f32[512,27], index: 0, kind: input, shape index: {}]   ;;  %s1726_s1 = inlined_call_operand.vmem [shape: bf16[27,32], index: 1, kind: input, shape index: {}]   ;;  %s1727_s2 = inlined_call_operand.vmem [shape: f32[1,32], index: 2, kind: input, shape index: {}]   ;;  %s1728_s3 = inlined_call_operand.vmem [shape: f32[1,32], index: 3, kind: input, shape index: {}]   ;;  %s1729_s4 = inlined_call_operand.vmem [shape: f32[1,32], index: 4, kind: input, shape index: {}]   ;;  %s1730_s5 = inlined_call_operand.hbm [shape: f32[512,32], index: 5, kind: output, shape index: {}]  }
   0x1   :  { %12 = vsyncpa [#allocation3 + $0x1], 0  ;;  %s1253_s18 = smov 0   ;;  %s1255_s19 = smov 0  }
   0x2   :  { %s1257_s20 = smov 0   ;;  %s1259_s21 = smov 0  }
   0x3 LB: > { %s1274_s22 = sadd.s32 4294967295, %s1217_s21   ;;  %s989_s23 = sadd.s32 4294967294, %s1217_s21   ;;  %s1217_s21 = sphi %s1259_s21, %s1736_s21   ;;  %s1213_s20 = sphi %s1257_s20, %s1735_s20   ;;  %s1209_s19 = sphi %s1255_s19, %s1734_s19   ;;  %s1205_s18 = sphi %s1253_s18, %s1733_s18  }
   0x4   : > { %s1278_s24 = sadd.s32 1, %s1217_s21   ;;  %s135_s25 = sadd.s32 1, %s1213_s20 }
   0x5   : > { %s132_s26 = ssub.s32 %s1217_s21, %s1278_s24  ;;  %p145_p0 = scmp.ne.s32.totalorder %s1213_s20, %s1209_s19 }
   0x6   : > { %p133_p1 = scmp.eq.s32.totalorder %s132_s26, 0  ;;  %p146_p2 = scmp.eq.s32.totalorder %s1274_s22, 3 }
   0x7   : > { %p151_p3 = scmp.ne.s32.totalorder %s1209_s19, %s1205_s18  ;;  %p152_p4 = scmp.eq.s32.totalorder %s989_s23, 3 }
   0x8   : > { %s1289_s27 = scalar_select %p133_p1, %s1213_s20, %s135_s25  }
   0x9   : > { %p1291_p5 = por %p146_p2, %p145_p0  ;;  %p1295_p6 = por %p152_p4, %p151_p3 }
   0xa   : > { %p992_p7 = scmp.ge.s32.totalorder %s1217_s21, 1  ;;  %p191_p8 = scmp.lt.s32.totalorder %s1217_s21, 5 }
   0xc   : > { %p192_p9 = pnand %p992_p7, %p191_p8 }
   0xd   : > { %s994_s7 = sshll.u32 (!%p192_p9), %s1274_s22, 4  ;;  %s216_s26 = sand.u32 (!%p192_p9), 1, %s1209_s19  }
   0xe   : > { %195 = sbr.rel (%p192_p9) target bundleno = 378 (0x17a), region = 40  ;;  %p220_p10 = scmp.lt.s32.totalorder (!%p192_p9), %s994_s7, 63 }
   0xf   : > { %s993_s30 = sshll.u32 (!%p192_p9), %s216_s26, 7 }
  0x10   : > { %s1513_s6 = scalar_lea.vmem (!%p192_p9), [#allocation2], %s993_s30 }
  0x11   : > { %s927_s8 = sshll.u32 (!%p192_p9), %s1513_s6, 4  ;;  %s1679_s8 = int_to_ptr.vmem [resolvable:$true] %s927_s8 }
  0x12   : > { %s1157_s12 = scalar_lea.vmem (!%p192_p9), %s1679_s8, 2048 }
  0x13   : > { %v1091_v0 = vld [vmem:[%s1726_s1 + $0x8] sm:$0x3f]   ;;  %vm298_vm0 = vcmask 1044480   ;;  %vm299_vm1 = vcmask 1045504   ;;  %v1219_v1 = vmov 65535   ;;  %v1092_v5 = vld [vmem:[%s1726_s1] sm:$0xff]   ;;  %p1158_p11 = scmp.ne.s32.totalorder %s1679_s8, %s1157_s12 }
  0x14   : > { %v300_v2 = vsel %vm298_vm0, 4294967295, %v1219_v1  ;;  %s1738_s7 = smov (!%p220_p10, %s994_s7), 63  ;;  %vm273_vm2 = vcmask 220160   ;;  %v1340_v30 = vld [vmem:[%s1727_s2] ss:$0 sm:$0xff]  ;;  %vm896_vm5 = vcmask 261120  }
  0x15   : > { %v301_v3 = vsel %vm299_vm1, %v300_v2, 0  ;;  %s995_s10 = sshll.u32 %s1738_s7, 3  ;;  %v1347_v35 = vld [vmem:[%s1728_s3] ss:$0 sm:$0xff]  ;;  %s1014_s7 = sshll.u32 %s1274_s22, 11 }
  0x16   : > { %v303_v4 = vand.u32 %v1091_v0, %v301_v3  ;;  %s1311_s13 = scalar_lea.vmem %s1725_s0, %s995_s10  ;;  %v1354_v42 = vld [vmem:[%s1729_s4] ss:$0 sm:$0xff]  ;;  %s1677_s11 = scalar_lea.hbm %s1730_s5, %s1014_s7 }
  0x17   : > { %v227_v6 = vld [vmem:[%s1311_s13] sm:$0xff]  ;;  %v228_v7 = vld [vmem:[%s1311_s13 + $0x8] sm:$0xff]  ;;  %v229_v11 = vld [vmem:[%s1311_s13 + $0x10] sm:$0xff]  ;;  %s1685_s22 = scalar_lea.sflag [#allocation3], %s216_s26  ;;  %p1159_p12 = pnand %p1158_p11, %p1291_p5 }
  0x18   : > { %1025 = vmatprep.subr.bf16.mxu0 %v303_v4  ;;  %1045 = vmatprep.subr.bf16.mxu1 %v303_v4  ;;  %v235_v8 = vld [vmem:[%s1311_s13 + $0x40] sm:$0xff]  ;;  %v243_v9 = vpack.c.bf16 %v228_v7, %v227_v6  ;;  %v236_v10 = vld [vmem:[%s1311_s13 + $0x48] sm:$0xff]  ;;  %v230_v12 = vld [vmem:[%s1311_s13 + $0x18] sm:$0xff] }
  0x19   : > { %1026 = vmatpush3.bf16.msra.mxu0 %v303_v4  ;;  %1047 = vmatpush3.bf16.msra.mxu1 %v303_v4  ;;  %v247_v13 = vpack.c.bf16 %v236_v10, %v235_v8  ;;  %v244_v14 = vpack.c.bf16 %v230_v12, %v229_v11  ;;  %v237_v15 = vld [vmem:[%s1311_s13 + $0x50] sm:$0xff]  ;;  %v238_v16 = vld [vmem:[%s1311_s13 + $0x58] sm:$0xff]  ;;  %v231_v17 = vld [vmem:[%s1311_s13 + $0x20] sm:$0xff]  ;;  %p1160_p13 = pneg %p1159_p12 }
  0x1a   : > { %1027 = vmatprep.subr.bf16.mxu0 %v1092_v5  ;;  %1046 = vmatprep.subr.bf16.mxu1 %v1092_v5  ;;  %v248_v18 = vpack.c.bf16 %v238_v16, %v237_v15  ;;  %v232_v19 = vld [vmem:[%s1311_s13 + $0x28] sm:$0xff]  ;;  %v239_v20 = vld [vmem:[%s1311_s13 + $0x60] sm:$0xff]  ;;  %v233_v24 = vld [vmem:[%s1311_s13 + $0x30] sm:$0xff] }
  0x1b   : > { %1029 = vmatprep.mubr.msk.bf16.mxu0 %vm273_vm2, %v243_v9  ;;  %v240_v21 = vld [vmem:[%s1311_s13 + $0x68] sm:$0xff]  ;;  %1037 = vmatprep.mubr.msk.bf16.mxu1 %vm273_vm2, %v247_v13  ;;  %v245_v22 = vpack.c.bf16 %v232_v19, %v231_v17  ;;  %v234_v25 = vld [vmem:[%s1311_s13 + $0x38] sm:$0xff]  ;;  %v241_v26 = vld [vmem:[%s1311_s13 + $0x70] sm:$0xff] }
  0x1c   : > { %v249_v23 = vpack.c.bf16 %v240_v21, %v239_v20  ;;  %v242_v27 = vld [vmem:[%s1311_s13 + $0x78] sm:$0xff]  ;;  %v246_v28 = vpack.c.bf16 %v234_v25, %v233_v24  ;;  %s1220_s13 = smov [#allocation2]  }
  0x1d   : > { %1028 = vmatpush3.bf16.msra.mxu0 %v1092_v5  ;;  %1048 = vmatpush3.bf16.msra.mxu1 %v1092_v5  ;;  %v250_v29 = vpack.c.bf16 %v242_v27, %v241_v26  ;;  %s1161_s14 = sshll.u32 %s1220_s13, 4  ;;  %s1162_s14 = int_to_ptr.vmem [resolvable:$false] %s1161_s14 }
  0x1e   : > { %s1163_s15 = scalar_lea.vmem %s1162_s14, 4096  ;;  %p1164_p0 = scmp.lt.s32.totalorder %s1679_s8, %s1162_s14 }
  0x1f   : > { %p1165_p1 = scmp.lt.s32.totalorder %s1163_s15, %s1157_s12 }
  0x20   : > { %1030 = vmatmul.mubr.msk.bf16.vlgmr.msra.gmra.mxu0 %vm273_vm2, %v244_v14  ;;  %1038 = vmatmul.mubr.msk.bf16.vlgmr.msra.gmra.mxu1 %vm273_vm2, %v248_v18 }
  0x21   : > { %1033 = vmatprep.mubr.msk.bf16.mxu0 %vm273_vm2, %v245_v22  ;;  %1041 = vmatprep.mubr.msk.bf16.mxu1 %vm273_vm2, %v249_v23  ;;  %p1166_p2 = por %p1165_p1, %p1164_p0 }
  0x23   : > { %p1167_p3 = pnand %p1166_p2, %p1160_p13 }
  0x28   : > { %1034 = vmatmul.mubr.msk.bf16.gmra.mxu0 %vm273_vm2, %v246_v28  ;;  %1042 = vmatmul.mubr.msk.bf16.gmra.mxu1 %vm273_vm2, %v250_v29 }
  0xe0   : > { %v1031_v31 = vpop.f32.mrf.mxu0  ;;  %v1039_v32 = vpop.f32.mrf.mxu1 }
  0xe1   : > { %v348_v33 = vadd.f32 %v1031_v31, %v1340_v30  ;;  %v380_v34 = vadd.f32 %v1039_v32, %v1340_v30 }
  0xe2   : > { %v339_v36 = vpop.f32.mrf.mxu0  ;;  %v371_v37 = vpop.f32.mrf.mxu1 }
  0xe3   : > { %v404_v38 = vmax.f32 %v348_v33, 0.0  ;;  %v412_v39 = vmax.f32 %v380_v34, 0.0  ;;  %v340_v40 = vadd.f32 %v1340_v30, %v339_v36  ;;  %v372_v41 = vadd.f32 %v1340_v30, %v371_v37 }
  0xe4   : > { %v1032_v43 = vpop.f32.mrf.mxu0  ;;  %v1040_v48 = vpop.f32.mrf.mxu1 }
  0xe5   : > { %v427_v44 = vmul.f32 %v1347_v35, %v404_v38  ;;  %v435_v45 = vmul.f32 %v1347_v35, %v412_v39  ;;  %v402_v46 = vmax.f32 %v340_v40, 0.0  ;;  %v410_v47 = vmax.f32 %v372_v41, 0.0 }
  0xe6   : > { %v351_v49 = vadd.f32 %v1032_v43, %v1340_v30  ;;  %v383_v54 = vadd.f32 %v1040_v48, %v1340_v30  ;;  %v342_v1 = vpop.f32.mrf.mxu0  ;;  %v374_v15 = vpop.f32.mrf.mxu1 }
  0xe7   : > { %v450_v50 = vadd.f32 %v1354_v42, %v427_v44  ;;  %v458_v51 = vadd.f32 %v1354_v42, %v435_v45  ;;  %v425_v52 = vmul.f32 %v1347_v35, %v402_v46  ;;  %v433_v53 = vmul.f32 %v1347_v35, %v410_v47 }
  0xe8   : > { %v405_v57 = vmax.f32 %v351_v49, 0.0  ;;  %v413_v0 = vmax.f32 %v383_v54, 0.0  ;;  %v343_v10 = vadd.f32 %v1340_v30, %v342_v1  ;;  %v375_v23 = vadd.f32 %v1340_v30, %v374_v15  ;;  %v1035_v37 = vpop.f32.mrf.mxu0 }
  0xe9   : > { %v1364_v55 = vmul.f32 0.70710677, %v450_v50  ;;  %v1366_v56 = vmul.f32 0.70710677, %v458_v51  ;;  %v448_v58 = vadd.f32 %v1354_v42, %v425_v52  ;;  %v1370_v59 = vadd.f32 %v1354_v42, %v433_v53 }
  0xea   : > { %v428_v4 = vmul.f32 %v1347_v35, %v405_v57  ;;  %v436_v14 = vmul.f32 %v1347_v35, %v413_v0  ;;  %v1385_v20 = vmul.f32 0.5, %v450_v50  ;;  %v403_v27 = vmax.f32 %v343_v10, 0.0 }
  0xeb   : > { %v498_v60 = vand.u32 2147483647, %v1364_v55  ;;  %v506_v61 = vand.u32 2147483647, %v1366_v56  ;;  %v1374_v62 = vmul.f32 0.70710677, %v448_v58  ;;  %v364_v49 = vadd.f32 %v1035_v37, %v1340_v30 }
  0xec   : > { %v1377_v63 = vmul.f32 0.70710677, %v1370_v59  ;;  %v451_v17 = vadd.f32 %v1354_v42, %v428_v4  ;;  %v459_v26 = vadd.f32 %v1354_v42, %v436_v14  ;;  %v1391_v28 = vmul.f32 0.5, %v458_v51 }
  0xed   : > { %v514_v2 = vmul.f32 0.3275911, %v498_v60  ;;  %v522_v3 = vmul.f32 0.3275911, %v506_v61  ;;  %v722_v5 = vsub.f32 0.0, %v498_v60  ;;  %v730_v11 = vsub.f32 0.0, %v506_v61 }
  0xee   : > { %v496_v6 = vand.u32 2147483647, %v1374_v62  ;;  %v504_v7 = vand.u32 2147483647, %v1377_v63  ;;  %v1387_v22 = vmul.f32 0.70710677, %v451_v17  ;;  %v426_v36 = vmul.f32 %v1347_v35, %v403_v27 }
  0xef   : > { %v530_v8 = vadd.f32 1.0, %v514_v2  ;;  %v538_v9 = vadd.f32 1.0, %v522_v3  ;;  %v738_v18 = vmul.f32 %v722_v5, %v498_v60  ;;  %v746_v24 = vmul.f32 %v730_v11, %v506_v61 }
  0xf0   : > { %v512_v12 = vmul.f32 0.3275911, %v496_v6  ;;  %v520_v13 = vmul.f32 0.3275911, %v504_v7  ;;  %v720_v16 = vsub.f32 0.0, %v496_v6  ;;  %v728_v25 = vsub.f32 0.0, %v504_v7 }
  0xf1   : > { %1093 = vrcp.f32 %v530_v8  ;;  %v499_v31 = vand.u32 2147483647, %v1387_v22  ;;  %v756_v32 = vmul.f32 1.442695, %v738_v18  ;;  %v1394_v33 = vmul.f32 0.5, %v448_v58 }
  0xf2   : > { %1095 = vrcp.f32 %v538_v9  ;;  %v528_v19 = vadd.f32 1.0, %v512_v12  ;;  %v536_v21 = vadd.f32 1.0, %v520_v13  ;;  %v736_v29 = vmul.f32 %v720_v16, %v496_v6 }
  0xf3   : > { %v1396_v34 = vmul.f32 0.70710677, %v459_v26  ;;  %v515_v38 = vmul.f32 0.3275911, %v499_v31  ;;  %v723_v39 = vsub.f32 0.0, %v499_v31  ;;  %v411_v40 = vmax.f32 %v375_v23, 0.0 }
  0xf4   : > { %1097 = vrcp.f32 %v528_v19  ;;  %v772_v41 = vmul.f32 1.442695, %v746_v24  ;;  %v744_v43 = vmul.f32 %v728_v25, %v504_v7  ;;  %v1401_v45 = vadd.f32 %v1354_v42, %v426_v36 }
  0xf5   : > { %1099 = vrcp.f32 %v536_v21  ;;  %v507_v44 = vand.u32 2147483647, %v1396_v34  ;;  %v752_v46 = vmul.f32 1.442695, %v736_v29  ;;  %v531_v47 = vadd.f32 1.0, %v515_v38  ;;  %v1043_v29 = vpop.f32.mrf.mxu1 }
  0xf6   : > { %v434_v48 = vmul.f32 %v1347_v35, %v411_v40  ;;  %1101 = vpow2.f32 %v756_v32  ;;  %v1406_v52 = vmul.f32 0.70710677, %v1401_v45  ;;  %v739_v53 = vmul.f32 %v723_v39, %v499_v31 }
  0xf7   : > { %v523_v50 = vmul.f32 0.3275911, %v507_v44  ;;  %v731_v51 = vsub.f32 0.0, %v507_v44  ;;  %1103 = vrcp.f32 %v531_v47  ;;  %v408_v57 = vmax.f32 %v364_v49, 0.0 }
  0xf8   : > { %v1409_v54 = vadd.f32 %v1354_v42, %v434_v48  ;;  %1105 = vpow2.f32 %v772_v41  ;;  %v497_v61 = vand.u32 2147483647, %v1406_v52  ;;  %v768_v0 = vmul.f32 1.442695, %v744_v43 }
  0xf9   : > { %v539_v58 = vadd.f32 1.0, %v523_v50  ;;  %v747_v60 = vmul.f32 %v731_v51, %v507_v44  ;;  %1107 = vpow2.f32 %v752_v46  ;;  %v431_v2 = vmul.f32 %v1347_v35, %v408_v57 }
  0xfa   : > { %v1413_v1 = vmul.f32 0.70710677, %v1409_v54  ;;  %v1419_v4 = vmul.f32 0.5, %v1370_v59  ;;  %v1421_v5 = vmul.f32 0.5, %v451_v17  ;;  %v513_v6 = vmul.f32 0.3275911, %v497_v61 }
  0xfb   : > { %1109 = vrcp.f32 %v539_v58  ;;  %v758_v9 = vmul.f32 1.442695, %v739_v53  ;;  %v1428_v11 = vadd.f32 %v1354_v42, %v431_v2  ;;  %v774_v13 = vmul.f32 1.442695, %v747_v60 }
  0xfc   : > { %v505_v10 = vand.u32 2147483647, %v1413_v1  ;;  %v529_v14 = vadd.f32 1.0, %v513_v6  ;;  %v721_v59 = vsub.f32 0.0, %v497_v61  ;;  %1111 = vpow2.f32 %v768_v0 }
  0xfd   : > { %v1431_v16 = vmul.f32 0.5, %v459_v26  ;;  %v1436_v23 = vmul.f32 0.70710677, %v1428_v11  ;;  %v396_v44 = vadd.f32 %v1043_v29, %v1340_v30  ;;  %vm818_vm3 = vcmp.ge.f32.partialorder %v1364_v55, 0.0 }
  0xfe   : > { %v1416_v3 = vpop.eup %1093  ;;  %v521_v17 = vmul.f32 0.3275911, %v505_v10  ;;  %1113 = vrcp.f32 %v529_v14  ;;  %v729_v21 = vsub.f32 0.0, %v505_v10  ;;  %v737_v32 = vmul.f32 %v721_v59, %v497_v61 }
  0xff   : > { %v1423_v7 = vpop.eup %1095  ;;  %v578_v8 = vmul.f32 1.0614054, %v1416_v3  ;;  %1115 = vpow2.f32 %v758_v9  ;;  %v502_v36 = vand.u32 2147483647, %v1436_v23  ;;  %v416_v60 = vmax.f32 %v396_v44, 0.0 }
 0x100   : > { %v586_v12 = vmul.f32 1.0614054, %v1423_v7  ;;  %v537_v27 = vadd.f32 1.0, %v521_v17  ;;  %1117 = vpow2.f32 %v774_v13  ;;  %v745_v41 = vmul.f32 %v729_v21, %v505_v10 }
 0x101   : > { %v594_v15 = vadd.f32 -1.4531521, %v578_v8  ;;  %v1433_v18 = vpop.eup %1097  ;;  %v518_v43 = vmul.f32 0.3275911, %v502_v36  ;;  %v726_v50 = vsub.f32 0.0, %v502_v36  ;;  %v439_v14 = vmul.f32 %v1347_v35, %v416_v60 }
 0x102   : > { %v602_v19 = vadd.f32 -1.4531521, %v586_v12  ;;  %v576_v25 = vmul.f32 1.0614054, %v1433_v18  ;;  %v1440_v31 = vpop.eup %1099  ;;  %1119 = vrcp.f32 %v537_v27  ;;  %v754_v57 = vmul.f32 1.442695, %v737_v32 }
 0x103   : > { %v610_v24 = vmul.f32 %v1416_v3, %v594_v15  ;;  %v584_v39 = vmul.f32 1.0614054, %v1440_v31  ;;  %v1102_v46 = vpop.eup %1101  ;;  %v534_v58 = vadd.f32 1.0, %v518_v43  ;;  %v770_v12 = vmul.f32 1.442695, %v745_v41 }
 0x104   : > { %v618_v26 = vmul.f32 %v1423_v7, %v602_v19  ;;  %v592_v38 = vadd.f32 -1.4531521, %v576_v25  ;;  %v1448_v51 = vpop.eup %1103  ;;  %v742_v13 = vmul.f32 %v726_v50, %v502_v36  ;;  %v1461_v27 = vadd.f32 %v1354_v42, %v439_v14 }
 0x105   : > { %v626_v37 = vadd.f32 1.4214138, %v610_v24  ;;  %v600_v49 = vadd.f32 -1.4531521, %v584_v39  ;;  %v1106_v61 = vpop.eup %1105  ;;  %v579_v8 = vmul.f32 1.0614054, %v1448_v51  ;;  %1121 = vrcp.f32 %v534_v58 }
 0x106   : > { %v634_v40 = vadd.f32 1.4214138, %v618_v26  ;;  %v608_v48 = vmul.f32 %v1433_v18, %v592_v38  ;;  %v1108_v9 = vpop.eup %1107  ;;  %1123 = vpow2.f32 %v754_v57  ;;  %vm826_vm4 = vcmp.ge.f32.partialorder %v1366_v56, 0.0 }
 0x107   : > { %v642_v47 = vmul.f32 %v1416_v3, %v626_v37  ;;  %v616_v6 = vmul.f32 %v1440_v31, %v600_v49  ;;  %v595_v21 = vadd.f32 -1.4531521, %v579_v8  ;;  %v1477_v58 = vmul.f32 0.70710677, %v1461_v27 }
 0x108   : > { %v650_v53 = vmul.f32 %v1423_v7, %v634_v40  ;;  %v624_v2 = vadd.f32 1.4214138, %v608_v48  ;;  %v1454_v59 = vpop.eup %1109  ;;  %v1466_v40 = vmul.f32 1.442695, %v742_v13  ;;  %vm816_vm6 = vcmp.ge.f32.partialorder %v1374_v62, 0.0 }
 0x109   : > { %v658_v0 = vadd.f32 -0.28449672, %v642_v47  ;;  %v632_v19 = vadd.f32 1.4214138, %v616_v6  ;;  %v587_v25 = vmul.f32 1.0614054, %v1454_v59  ;;  %v611_v36 = vmul.f32 %v1448_v51, %v595_v21  ;;  %v1112_v37 = vpop.eup %1111 }
 0x10a   : > { %v666_v10 = vadd.f32 -0.28449672, %v650_v53  ;;  %v640_v17 = vmul.f32 %v1433_v18, %v624_v2  ;;  %v1487_v14 = vand.u32 2147483647, %v1477_v58  ;;  %vm824_vm7 = vcmp.ge.f32.partialorder %v1377_v63, 0.0 }
 0x10b   : > { %v674_v15 = vmul.f32 %v1416_v3, %v658_v0  ;;  %v648_v32 = vmul.f32 %v1440_v31, %v632_v19  ;;  %v603_v39 = vadd.f32 -1.4531521, %v587_v25  ;;  %v1468_v41 = vpop.eup %1113  ;;  %v627_v48 = vadd.f32 1.4214138, %v611_v36 }
 0x10c   : > { %v682_v24 = vmul.f32 %v1423_v7, %v666_v10  ;;  %v656_v26 = vadd.f32 -0.28449672, %v640_v17  ;;  %v1116_v49 = vpop.eup %1115  ;;  %v577_v57 = vmul.f32 1.0614054, %v1468_v41  ;;  %1125 = vpow2.f32 %v770_v12 }
 0x10d   : > { %v690_v29 = vadd.f32 0.2548296, %v674_v15  ;;  %v664_v47 = vadd.f32 -0.28449672, %v648_v32  ;;  %v619_v53 = vmul.f32 %v1454_v59, %v603_v39  ;;  %v1479_v60 = vpop.eup %1117  ;;  %v643_v6 = vmul.f32 %v1448_v51, %v627_v48 }
 0x10e   : > { %v698_v38 = vadd.f32 0.2548296, %v682_v24  ;;  %v672_v44 = vmul.f32 %v1433_v18, %v656_v26  ;;  %v593_v13 = vadd.f32 -1.4531521, %v577_v57  ;;  %vm819_vm8 = vcmp.ge.f32.partialorder %v1387_v22, 0.0 }
 0x10f   : > { %v706_v43 = vmul.f32 %v1416_v3, %v690_v29  ;;  %v680_v2 = vmul.f32 %v1440_v31, %v664_v47  ;;  %v1483_v8 = vpop.eup %1119  ;;  %v635_v10 = vadd.f32 1.4214138, %v619_v53  ;;  %v659_v19 = vadd.f32 -0.28449672, %v643_v6 }
 0x110   : > { %v714_v50 = vmul.f32 %v1423_v7, %v698_v38  ;;  %v688_v0 = vadd.f32 0.2548296, %v672_v44  ;;  %v585_v25 = vmul.f32 1.0614054, %v1483_v8  ;;  %1127 = vpow2.f32 %v1466_v40 }
 0x111   : > { %v786_v3 = vmul.f32 %v1102_v46, %v706_v43  ;;  %v696_v17 = vadd.f32 0.2548296, %v680_v2  ;;  %v651_v24 = vmul.f32 %v1454_v59, %v635_v10  ;;  %v675_v36 = vmul.f32 %v1448_v51, %v659_v19 }
 0x112   : > { %v794_v7 = vmul.f32 %v1106_v61, %v714_v50  ;;  %v704_v46 = vmul.f32 %v1433_v18, %v688_v0  ;;  %v609_v61 = vmul.f32 %v1468_v41, %v593_v13  ;;  %v1506_v57 = vpop.eup %1121  ;;  %vm827_vm9 = vcmp.ge.f32.partialorder %v1396_v34, 0.0 }
 0x113   : > { %v802_v15 = vsub.f32 1.0, %v786_v3  ;;  %v712_v32 = vmul.f32 %v1440_v31, %v696_v17  ;;  %v667_v38 = vadd.f32 -0.28449672, %v651_v24  ;;  %v691_v48 = vadd.f32 0.2548296, %v675_v36  ;;  %v1124_v56 = vpop.eup %1123 }
 0x114   : > { %v810_v21 = vsub.f32 1.0, %v794_v7  ;;  %v784_v26 = vmul.f32 %v1108_v9, %v704_v46  ;;  %v625_v39 = vadd.f32 1.4214138, %v609_v61  ;;  %v601_v7 = vadd.f32 -1.4531521, %v585_v25 }
 0x115   : > { %v834_v29 = vsub.f32 0.0, %v802_v15  ;;  %v792_v47 = vmul.f32 %v1112_v37, %v712_v32  ;;  %v683_v31 = vmul.f32 %v1454_v59, %v667_v38  ;;  %v707_v55 = vmul.f32 %v1448_v51, %v691_v48  ;;  %v387_v38 = vpop.f32.mrf.mxu1 }
 0x116   : > { %v842_v18 = vsub.f32 0.0, %v810_v21  ;;  %v800_v44 = vsub.f32 1.0, %v784_v26  ;;  %v641_v53 = vmul.f32 %v1468_v41, %v625_v39  ;;  %v617_v19 = vmul.f32 %v1483_v8, %v601_v7 }
 0x117   : > { %v850_v43 = vsel %vm818_vm3, %v802_v15, %v834_v29  ;;  %v808_v0 = vsub.f32 1.0, %v792_v47  ;;  %v699_v2 = vadd.f32 0.2548296, %v683_v31  ;;  %v787_v46 = vmul.f32 %v1116_v49, %v707_v55  ;;  %v1044_v31 = vpop.f32.mrf.mxu1 }
 0x118   : > { %v866_v50 = vadd.f32 1.0, %v850_v43  ;;  %v858_v9 = vsel %vm826_vm4, %v810_v21, %v842_v18  ;;  %v832_v12 = vsub.f32 0.0, %v800_v44  ;;  %v657_v6 = vadd.f32 -0.28449672, %v641_v53  ;;  %v355_v18 = vpop.f32.mrf.mxu0 }
 0x119   : > { %v874_v3 = vadd.f32 1.0, %v858_v9  ;;  %v840_v15 = vsub.f32 0.0, %v808_v0  ;;  %v582_v49 = vmul.f32 1.0614054, %v1506_v57  ;;  %v526_v21 = vmul.f32 0.3275911, %v1487_v14 }
 0x11a   : > { %v882_v37 = vmul.f32 %v866_v50, %v1385_v20  ;;  %v848_v13 = vsel %vm816_vm6, %v800_v44, %v832_v12  ;;  %v715_v20 = vmul.f32 %v1454_v59, %v699_v2  ;;  %v673_v17 = vmul.f32 %v1468_v41, %v657_v6  ;;  %v1126_v50 = vpop.eup %1125  ;;  %v1036_v9 = vpop.f32.mrf.mxu0 }
 0x11b   : > { %v890_v10 = vmul.f32 %v874_v3, %v1391_v28  ;;  %v864_v51 = vadd.f32 1.0, %v848_v13  ;;  %v856_v62 = vsel %vm824_vm7, %v808_v0, %v840_v15  ;;  %v803_v28 = vsub.f32 1.0, %v787_v46 }
 0x11c   : > { %899 = vst.msk [vmem:[%s1513_s6 + $0x10] sm:$0xff] %vm896_vm5, %v882_v37  ;;  %v872_v61 = vadd.f32 1.0, %v856_v62  ;;  %v795_v59 = vmul.f32 %v1479_v60, %v715_v20  ;;  %v689_v25 = vadd.f32 0.2548296, %v673_v17  ;;  %v633_v26 = vadd.f32 1.4214138, %v617_v19 }
 0x11d   : > { %907 = vst.msk [vmem:[%s1513_s6 + $0x50] sm:$0xff] %vm896_vm5, %v890_v10  ;;  %v880_v24 = vmul.f32 %v864_v51, %v1394_v33  ;;  %v835_v29 = vsub.f32 0.0, %v803_v28  ;;  %v598_v32 = vadd.f32 -1.4531521, %v582_v49  ;;  %v542_v36 = vadd.f32 1.0, %v526_v21 }
 0x11e   : > { %v888_v63 = vmul.f32 %v872_v61, %v1419_v4  ;;  %v811_v39 = vsub.f32 1.0, %v795_v59  ;;  %v705_v43 = vmul.f32 %v1468_v41, %v689_v25  ;;  %v649_v60 = vmul.f32 %v1483_v8, %v633_v26 }
 0x11f   : > { %897 = vst.msk [vmem:[%s1513_s6] sm:$0xff] %vm896_vm5, %v880_v24  ;;  %v851_v33 = vsel %vm819_vm8, %v803_v28, %v835_v29  ;;  %v614_v44 = vmul.f32 %v1506_v57, %v598_v32  ;;  %1129 = vrcp.f32 %v542_v36  ;;  %vm817_vm10 = vcmp.ge.f32.partialorder %v1406_v52, 0.0  ;;  %v1128_v32 = vpop.eup %1127 }
 0x120   : > { %905 = vst.msk [vmem:[%s1513_s6 + $0x40] sm:$0xff] %vm896_vm5, %v888_v63  ;;  %v867_v47 = vadd.f32 1.0, %v851_v33  ;;  %v843_v48 = vsub.f32 0.0, %v811_v39  ;;  %v785_v4 = vmul.f32 %v1124_v56, %v705_v43  ;;  %v665_v40 = vadd.f32 -0.28449672, %v649_v60 }
 0x121   : > { %v630_v41 = vadd.f32 1.4214138, %v614_v44  ;;  %v356_v22 = vadd.f32 %v1340_v30, %v355_v18  ;;  %v734_v0 = vsub.f32 0.0, %v1487_v14  ;;  %v388_v7 = vadd.f32 %v1340_v30, %v387_v38  ;;  %v358_v38 = vpop.f32.mrf.mxu0 }
 0x122   : > { %v883_v53 = vmul.f32 %v867_v47, %v1421_v5  ;;  %v859_v3 = vsel %vm827_vm9, %v811_v39, %v843_v48  ;;  %v801_v12 = vsub.f32 1.0, %v785_v4  ;;  %v681_v34 = vmul.f32 %v1483_v8, %v665_v40 }
 0x123   : > { %v875_v55 = vadd.f32 1.0, %v859_v3  ;;  %v646_v37 = vmul.f32 %v1506_v57, %v630_v41  ;;  %v406_v2 = vmax.f32 %v356_v22, 0.0  ;;  %v367_v56 = vadd.f32 %v1036_v9, %v1340_v30  ;;  %v390_v3 = vpop.f32.mrf.mxu1 }
 0x124   : > { %900 = vst.msk [vmem:[%s1513_s6 + $0x18] sm:$0xff] %vm896_vm5, %v883_v53  ;;  %v833_v6 = vsub.f32 0.0, %v801_v12  ;;  %v399_v5 = vadd.f32 %v1044_v31, %v1340_v30  ;;  %v697_v13 = vadd.f32 0.2548296, %v681_v34  ;;  %v465_v51 = vmul.f32 0.5, %v1401_v45 }
 0x125   : > { %v891_v10 = vmul.f32 %v875_v55, %v1431_v16  ;;  %v662_v15 = vadd.f32 -0.28449672, %v646_v37  ;;  %v429_v46 = vmul.f32 %v1347_v35, %v406_v2  ;;  %v414_v17 = vmax.f32 %v388_v7, 0.0 }
 0x126   : > { %v849_v20 = vsel %vm817_vm10, %v801_v12, %v833_v6  ;;  %v409_v19 = vmax.f32 %v367_v56, 0.0  ;;  %v713_v28 = vmul.f32 %v1483_v8, %v697_v13  ;;  %v750_v21 = vmul.f32 %v734_v0, %v1487_v14 }
 0x127   : > { %908 = vst.msk [vmem:[%s1513_s6 + $0x58] sm:$0xff] %vm896_vm5, %v891_v10  ;;  %v865_v62 = vadd.f32 1.0, %v849_v20  ;;  %v678_v49 = vmul.f32 %v1506_v57, %v662_v15  ;;  %v1561_v16 = vadd.f32 %v1354_v42, %v429_v46  ;;  %v437_v45 = vmul.f32 %v1347_v35, %v414_v17 }
 0x128   : > { %v432_v52 = vmul.f32 %v1347_v35, %v409_v19  ;;  %v793_v61 = vmul.f32 %v1126_v50, %v713_v28  ;;  %v417_v25 = vmax.f32 %v399_v5, 0.0  ;;  %v473_v29 = vmul.f32 0.5, %v1409_v54 }
 0x129   : > { %v881_v24 = vmul.f32 %v865_v62, %v465_v51  ;;  %v694_v59 = vadd.f32 0.2548296, %v678_v49  ;;  %v1568_v26 = vmul.f32 0.70710677, %v1561_v16  ;;  %v1571_v8 = vadd.f32 %v1354_v42, %v437_v45 }
 0x12a   : > { %v809_v14 = vsub.f32 1.0, %v793_v61  ;;  %vm825_vm11 = vcmp.ge.f32.partialorder %v1413_v1, 0.0  ;;  %v1578_v18 = vadd.f32 %v1354_v42, %v432_v52  ;;  %v780_v54 = vmul.f32 1.442695, %v750_v21 }
 0x12b   : > { %898 = vst.msk [vmem:[%s1513_s6 + $0x8] sm:$0xff] %vm896_vm5, %v881_v24  ;;  %v710_v36 = vmul.f32 %v1506_v57, %v694_v59  ;;  %v500_v39 = vand.u32 2147483647, %v1568_v26  ;;  %v1582_v43 = vmul.f32 0.70710677, %v1571_v8  ;;  %v440_v47 = vmul.f32 %v1347_v35, %v417_v25 }
 0x12c   : > { %v1130_v63 = vpop.eup %1129  ;;  %v841_v33 = vsub.f32 0.0, %v809_v14  ;;  %vm822_vm12 = vcmp.ge.f32.partialorder %v1436_v23, 0.0  ;;  %v359_v4 = vadd.f32 %v1340_v30, %v358_v38  ;;  %v1591_v22 = vmul.f32 0.70710677, %v1578_v18 }
 0x12d   : > { %v790_v60 = vmul.f32 %v1128_v32, %v710_v36  ;;  %v590_v44 = vmul.f32 1.0614054, %v1130_v63  ;;  %v516_v48 = vmul.f32 0.3275911, %v500_v39  ;;  %v508_v57 = vand.u32 2147483647, %v1582_v43 }
 0x12e   : > { %v857_v50 = vsel %vm825_vm11, %v809_v14, %v841_v33  ;;  %1131 = vpow2.f32 %v780_v54  ;;  %v503_v55 = vand.u32 2147483647, %v1591_v22  ;;  %v1595_v34 = vadd.f32 %v1354_v42, %v440_v47 }
 0x12f   : > { %v806_v40 = vsub.f32 1.0, %v790_v60  ;;  %v606_v41 = vadd.f32 -1.4531521, %v590_v44  ;;  %v873_v9 = vadd.f32 1.0, %v857_v50  ;;  %v532_v31 = vadd.f32 1.0, %v516_v48 }
 0x130   : > { %v524_v53 = vmul.f32 0.3275911, %v508_v57  ;;  %v407_v2 = vmax.f32 %v359_v4, 0.0  ;;  %v519_v56 = vmul.f32 0.3275911, %v503_v55  ;;  %v391_v5 = vadd.f32 %v1340_v30, %v390_v3 }
 0x131   : > { %v838_v12 = vsub.f32 0.0, %v806_v40  ;;  %v622_v0 = vmul.f32 %v1130_v63, %v606_v41  ;;  %v889_v1 = vmul.f32 %v873_v9, %v473_v29  ;;  %1133 = vrcp.f32 %v532_v31 }
 0x132   : > { %v540_v37 = vadd.f32 1.0, %v524_v53  ;;  %v470_v10 = vmul.f32 0.5, %v1428_v11  ;;  %v535_v46 = vadd.f32 1.0, %v519_v56  ;;  %v1604_v20 = vmul.f32 0.70710677, %v1595_v34 }
 0x133   : > { %v854_v6 = vsel %vm822_vm12, %v806_v40, %v838_v12  ;;  %v638_v7 = vadd.f32 1.4214138, %v622_v0  ;;  %906 = vst.msk [vmem:[%s1513_s6 + $0x48] sm:$0xff] %vm896_vm5, %v889_v1  ;;  %v430_v23 = vmul.f32 %v1347_v35, %v407_v2  ;;  %v415_v19 = vmax.f32 %v391_v5, 0.0 }
 0x134   : > { %v870_v13 = vadd.f32 1.0, %v854_v6  ;;  %1135 = vrcp.f32 %v540_v37  ;;  %v724_v62 = vsub.f32 0.0, %v500_v39  ;;  %v511_v30 = vand.u32 2147483647, %v1604_v20 }
 0x135   : > { %v654_v15 = vmul.f32 %v1130_v63, %v638_v7  ;;  %1137 = vrcp.f32 %v535_v46  ;;  %v1611_v11 = vadd.f32 %v1354_v42, %v430_v23  ;;  %v438_v49 = vmul.f32 %v1347_v35, %v415_v19 }
 0x136   : > { %v886_v51 = vmul.f32 %v870_v13, %v470_v10  ;;  %v527_v21 = vmul.f32 0.3275911, %v511_v30  ;;  %v732_v52 = vsub.f32 0.0, %v508_v57  ;;  %v740_v59 = vmul.f32 %v724_v62, %v500_v39 }
 0x137   : > { %v670_v17 = vadd.f32 -0.28449672, %v654_v15  ;;  %v1615_v24 = vmul.f32 0.70710677, %v1611_v11  ;;  %v1618_v61 = vadd.f32 %v1354_v42, %v438_v49  ;;  %v727_v14 = vsub.f32 0.0, %v503_v55 }
 0x138   : > { %903 = vst.msk [vmem:[%s1513_s6 + $0x30] sm:$0xff] %vm896_vm5, %v886_v51  ;;  %v543_v25 = vadd.f32 1.0, %v527_v21  ;;  %v748_v33 = vmul.f32 %v732_v52, %v508_v57  ;;  %v760_v47 = vmul.f32 1.442695, %v740_v59  ;;  %vm830_vm13 = vcmp.ge.f32.partialorder %v1477_v58, 0.0 }
 0x139   : > { %v686_v28 = vmul.f32 %v1130_v63, %v670_v17  ;;  %v501_v36 = vand.u32 2147483647, %v1615_v24  ;;  %v1622_v38 = vmul.f32 0.70710677, %v1618_v61  ;;  %v743_v39 = vmul.f32 %v727_v14, %v503_v55 }
 0x13a   : > { %1139 = vrcp.f32 %v543_v25  ;;  %v776_v31 = vmul.f32 1.442695, %v748_v33  ;;  %v735_v57 = vsub.f32 0.0, %v511_v30  ;;  %v478_v0 = vmul.f32 0.5, %v1461_v27 }
 0x13b   : > { %v702_v45 = vadd.f32 0.2548296, %v686_v28  ;;  %v1132_v29 = vpop.eup %1131  ;;  %v517_v60 = vmul.f32 0.3275911, %v501_v36  ;;  %v509_v42 = vand.u32 2147483647, %v1622_v38 }
 0x13c   : > { %v766_v37 = vmul.f32 1.442695, %v743_v39  ;;  %v751_v13 = vmul.f32 %v735_v57, %v511_v30  ;;  %v725_v46 = vsub.f32 0.0, %v501_v36  ;;  %vm820_vm14 = vcmp.ge.f32.partialorder %v1568_v26, 0.0 }
 0x13d   : > { %v718_v32 = vmul.f32 %v1130_v63, %v702_v45  ;;  %v533_v4 = vadd.f32 1.0, %v517_v60  ;;  %v525_v40 = vmul.f32 0.3275911, %v509_v42  ;;  %v733_v19 = vsub.f32 0.0, %v509_v42 }
 0x13e   : > { %v1134_v35 = vpop.eup %1133  ;;  %v782_v21 = vmul.f32 1.442695, %v751_v13  ;;  %v741_v52 = vmul.f32 %v725_v46, %v501_v36  ;;  %vm828_vm15 = vcmp.ge.f32.partialorder %v1582_v43, 0.0  ;;  %vm823_vm0 = vcmp.ge.f32.partialorder %v1591_v22, 0.0 }
 0x13f   : > { %v798_v54 = vmul.f32 %v1132_v29, %v718_v32  ;;  %v580_v44 = vmul.f32 1.0614054, %v1134_v35  ;;  %1141 = vrcp.f32 %v533_v4  ;;  %v541_v3 = vadd.f32 1.0, %v525_v40 }
 0x140   : > { %1143 = vpow2.f32 %v760_v47  ;;  %v749_v32 = vmul.f32 %v733_v19, %v509_v42  ;;  %v762_v39 = vmul.f32 1.442695, %v741_v52  ;;  %vm831_vm1 = vcmp.ge.f32.partialorder %v1604_v20, 0.0 }
 0x141   : > { %v814_v48 = vsub.f32 1.0, %v798_v54  ;;  %v1136_v50 = vpop.eup %1135  ;;  %v596_v63 = vadd.f32 -1.4531521, %v580_v44  ;;  %1145 = vrcp.f32 %v541_v3  ;;  %vm821_vm2 = vcmp.ge.f32.partialorder %v1615_v24, 0.0 }
 0x142   : > { %v588_v9 = vmul.f32 1.0614054, %v1136_v50  ;;  %v1138_v12 = vpop.eup %1137  ;;  %1147 = vpow2.f32 %v776_v31  ;;  %v778_v42 = vmul.f32 1.442695, %v749_v32  ;;  %v471_v32 = vmul.f32 0.5, %v1578_v18 }
 0x143   : > { %v846_v41 = vsub.f32 0.0, %v814_v48  ;;  %v612_v53 = vmul.f32 %v1134_v35, %v596_v63  ;;  %v583_v58 = vmul.f32 1.0614054, %v1138_v12  ;;  %1149 = vpow2.f32 %v766_v37 }
 0x144   : > { %v604_v55 = vadd.f32 -1.4531521, %v588_v9  ;;  %1151 = vpow2.f32 %v782_v21  ;;  %vm829_vm3 = vcmp.ge.f32.partialorder %v1622_v38, 0.0 }
 0x145   : > { %v862_v1 = vsel %vm830_vm13, %v814_v48, %v846_v41  ;;  %v628_v6 = vadd.f32 1.4214138, %v612_v53  ;;  %v599_v10 = vadd.f32 -1.4531521, %v583_v58  ;;  %1153 = vpow2.f32 %v762_v39 }
 0x146   : > { %v878_v2 = vadd.f32 1.0, %v862_v1  ;;  %v620_v7 = vmul.f32 %v1136_v50, %v604_v55  ;;  %1155 = vpow2.f32 %v778_v42 }
 0x147   : > { %v644_v5 = vmul.f32 %v1134_v35, %v628_v6  ;;  %v615_v27 = vmul.f32 %v1138_v12, %v599_v10  ;;  %v1629_v17 = vpop.eup %1139 }
 0x148   : > { %v894_v56 = vmul.f32 %v878_v2, %v478_v0  ;;  %v636_v15 = vadd.f32 1.4214138, %v620_v7  ;;  %v591_v49 = vmul.f32 1.0614054, %v1629_v17 }
 0x149   : > { %v660_v51 = vadd.f32 -0.28449672, %v644_v5  ;;  %v631_v28 = vadd.f32 1.4214138, %v615_v27 }
 0x14a   : > { %911 = vst.msk [vmem:[%s1513_s6 + $0x70] sm:$0xff] %vm896_vm5, %v894_v56  ;;  %v652_v23 = vmul.f32 %v1136_v50, %v636_v15  ;;  %v607_v25 = vadd.f32 -1.4531521, %v591_v49  ;;  %v468_v15 = vmul.f32 0.5, %v1561_v16 }
 0x14b   : > { %v676_v62 = vmul.f32 %v1134_v35, %v660_v51  ;;  %v647_v30 = vmul.f32 %v1138_v12, %v631_v28 }
 0x14c   : > { %v668_v45 = vadd.f32 -0.28449672, %v652_v23  ;;  %v1632_v14 = vpop.eup %1141  ;;  %v623_v60 = vmul.f32 %v1629_v17, %v607_v25 }
 0x14d   : > { %v692_v59 = vadd.f32 0.2548296, %v676_v62  ;;  %v663_v33 = vadd.f32 -0.28449672, %v647_v30  ;;  %v1144_v44 = vpop.eup %1143  ;;  %v581_v48 = vmul.f32 1.0614054, %v1632_v14 }
 0x14e   : > { %v684_v29 = vmul.f32 %v1136_v50, %v668_v45  ;;  %v639_v36 = vadd.f32 1.4214138, %v623_v60  ;;  %v1636_v40 = vpop.eup %1145  ;;  %v476_v62 = vmul.f32 0.5, %v1571_v8 }
 0x14f   : > { %v708_v54 = vmul.f32 %v1134_v35, %v692_v59  ;;  %v679_v63 = vmul.f32 %v1138_v12, %v663_v33  ;;  %v597_v9 = vadd.f32 -1.4531521, %v581_v48  ;;  %v1148_v31 = vpop.eup %1147  ;;  %v589_v3 = vmul.f32 1.0614054, %v1636_v40 }
 0x150   : > { %v700_v47 = vadd.f32 0.2548296, %v684_v29  ;;  %v655_v57 = vmul.f32 %v1629_v17, %v639_v36  ;;  %v1150_v58 = vpop.eup %1149 }
 0x151   : > { %v788_v4 = vmul.f32 %v1144_v44, %v708_v54  ;;  %v695_v35 = vadd.f32 0.2548296, %v679_v63  ;;  %v613_v1 = vmul.f32 %v1632_v14, %v597_v9  ;;  %v605_v6 = vadd.f32 -1.4531521, %v589_v3  ;;  %v1152_v59 = vpop.eup %1151 }
 0x152   : > { %v716_v41 = vmul.f32 %v1136_v50, %v700_v47  ;;  %v671_v2 = vadd.f32 -0.28449672, %v655_v57  ;;  %v1154_v22 = vpop.eup %1153  ;;  %v469_v57 = vmul.f32 0.5, %v1611_v11 }
 0x153   : > { %v804_v53 = vsub.f32 1.0, %v788_v4  ;;  %v711_v37 = vmul.f32 %v1138_v12, %v695_v35  ;;  %v629_v7 = vadd.f32 1.4214138, %v613_v1  ;;  %v621_v13 = vmul.f32 %v1636_v40, %v605_v6  ;;  %v1156_v18 = vpop.eup %1155 }
 0x154   : > { %v796_v0 = vmul.f32 %v1148_v31, %v716_v41  ;;  %v687_v10 = vmul.f32 %v1629_v17, %v671_v2  ;;  %v479_v41 = vmul.f32 0.5, %v1595_v34  ;;  %v477_v1 = vmul.f32 0.5, %v1618_v61 }
 0x155   : > { %v836_v55 = vsub.f32 0.0, %v804_v53  ;;  %v791_v5 = vmul.f32 %v1150_v58, %v711_v37  ;;  %v645_v12 = vmul.f32 %v1632_v14, %v629_v7  ;;  %v637_v23 = vadd.f32 1.4214138, %v621_v13 }
 0x156   : > { %v812_v50 = vsub.f32 1.0, %v796_v0  ;;  %v703_v26 = vadd.f32 0.2548296, %v687_v10 }
 0x157   : > { %v852_v56 = vsel %vm820_vm14, %v804_v53, %v836_v55  ;;  %v807_v27 = vsub.f32 1.0, %v791_v5  ;;  %v661_v49 = vadd.f32 -0.28449672, %v645_v12  ;;  %v653_v52 = vmul.f32 %v1636_v40, %v637_v23 }
 0x158   : > { %v868_v46 = vadd.f32 1.0, %v852_v56  ;;  %v844_v51 = vsub.f32 0.0, %v812_v50  ;;  %v719_v16 = vmul.f32 %v1629_v17, %v703_v26 }
 0x159   : > { %v839_v45 = vsub.f32 0.0, %v807_v27  ;;  %v677_v43 = vmul.f32 %v1632_v14, %v661_v49  ;;  %v669_v29 = vadd.f32 -0.28449672, %v653_v52 }
 0x15a   : > { %v884_v19 = vmul.f32 %v868_v46, %v468_v15  ;;  %v860_v28 = vsel %vm828_vm15, %v812_v50, %v844_v51  ;;  %v799_v8 = vmul.f32 %v1152_v59, %v719_v16 }
 0x15b   : > { %v876_v21 = vadd.f32 1.0, %v860_v28  ;;  %v855_v25 = vsel %vm823_vm0, %v807_v27, %v839_v45  ;;  %v693_v33 = vadd.f32 0.2548296, %v677_v43  ;;  %v685_v60 = vmul.f32 %v1636_v40, %v669_v29 }
 0x15c   : > { %901 = vst.msk [vmem:[%s1513_s6 + $0x20] sm:$0xff] %vm896_vm5, %v884_v19  ;;  %v871_v54 = vadd.f32 1.0, %v855_v25  ;;  %v815_v17 = vsub.f32 1.0, %v799_v8 }
 0x15d   : > { %v892_v30 = vmul.f32 %v876_v21, %v476_v62  ;;  %v709_v47 = vmul.f32 %v1632_v14, %v693_v33  ;;  %v701_v39 = vadd.f32 0.2548296, %v685_v60 }
 0x15e   : > { %v887_v44 = vmul.f32 %v871_v54, %v471_v32  ;;  %v847_v48 = vsub.f32 0.0, %v815_v17 }
 0x15f   : > { %909 = vst.msk [vmem:[%s1513_s6 + $0x60] sm:$0xff] %vm896_vm5, %v892_v30  ;;  %v789_v4 = vmul.f32 %v1154_v22, %v709_v47  ;;  %v717_v36 = vmul.f32 %v1636_v40, %v701_v39 }
 0x160   : > { %904 = vst.msk [vmem:[%s1513_s6 + $0x38] sm:$0xff] %vm896_vm5, %v887_v44  ;;  %v863_v63 = vsel %vm831_vm1, %v815_v17, %v847_v48 }
 0x161   : > { %v879_v9 = vadd.f32 1.0, %v863_v63  ;;  %v805_v42 = vsub.f32 1.0, %v789_v4  ;;  %v797_v14 = vmul.f32 %v1156_v18, %v717_v36 }
 0x163   : > { %v895_v31 = vmul.f32 %v879_v9, %v479_v41  ;;  %v837_v53 = vsub.f32 0.0, %v805_v42  ;;  %v813_v35 = vsub.f32 1.0, %v797_v14 }
 0x165   : > { %912 = vst.msk [vmem:[%s1513_s6 + $0x78] sm:$0xff] %vm896_vm5, %v895_v31  ;;  %v853_v20 = vsel %vm821_vm2, %v805_v42, %v837_v53  ;;  %v845_v3 = vsub.f32 0.0, %v813_v35 }
 0x166   : > { %v869_v40 = vadd.f32 1.0, %v853_v20 }
 0x167   : > { %v861_v0 = vsel %vm829_vm3, %v813_v35, %v845_v3 }
 0x168   : > { %v885_v34 = vmul.f32 %v869_v40, %v469_v57  ;;  %v877_v24 = vadd.f32 1.0, %v861_v0 }
 0x16a   : > { %902 = vst.msk [vmem:[%s1513_s6 + $0x28] sm:$0xff] %vm896_vm5, %v885_v34  ;;  %v893_v11 = vmul.f32 %v877_v24, %v477_v1 }
 0x16c   : > { %910 = vst.msk [vmem:[%s1513_s6 + $0x68] sm:$0xff] %vm896_vm5, %v893_v11 }
 0x16d   : > { %1170 = shalt.err (!%p1167_p3)
}
 0x16e   : > { %s1171_s16 = scalar_lea.hbm %s1677_s11, 2048  ;;  %s1175_s25 = scalar_lea.hbm %s1730_s5, 8192 }
 0x16f   : > { %p1172_p4 = scmp.ne.s32.totalorder %s1677_s11, %s1171_s16  ;;  %p1176_p9 = scmp.lt.s32.totalorder %s1677_s11, %s1730_s5 }
 0x170   : > { %p1177_p10 = scmp.lt.s32.totalorder %s1175_s25, %s1171_s16 }
 0x171   : > { %p1173_p7 = pnand %p1172_p4, %p1291_p5 }
 0x172   : > { %p1178_p11 = por %p1177_p10, %p1176_p9 }
 0x173   : > { %p1174_p8 = pneg %p1173_p7 }
 0x175   : > { %p1179_p12 = pnand %p1178_p11, %p1174_p8 }
 0x177   : > { %1182 = shalt.err (!%p1179_p12)
}
 0x178   : > { %s1221_s6 = smov 128   ;;  %s1222_s7 = smov 8  }
 0x179   : > { %1049 = dma.vmem_to_hbm [thread:$0]  (%p1291_p5), %s1679_s8, 2048, %s1677_s11, %s1685_s22, %s1221_s6, %s1221_s6, %s1222_s7  }
 0x17a PF: > { %p1055_p13 = scmp.ge.s32.totalorder %s1217_s21, 2  ;;  %s942_s9 = sand.u32 1, %s1205_s18  }
 0x17b   : > { %s943_s10 = scalar_lea.sflag [#allocation3], %s942_s9 }
 0x17c   : > { %p1052_p0 = pnand %p1055_p13, %p1295_p6 }
 0x17e   : > { %p1053_p1 = pneg %p1052_p0 }
 0x180   : > { %1200 = dma.done.wait (%p1053_p1), %s943_s10, 2048  }
 0x181   : > { %1202 = vsyncadd (%p1053_p1), %s943_s10, 4294965248  ;;  %p15_p2 = scmp.ge.s32.totalorder %s1278_s24, 6   ;;  %s1733_s18 = smov %s1209_s19 }
 0x182   : > { %s1734_s19 = smov %s1213_s20  ;;  %s1735_s20 = smov %s1289_s27 }
 0x183   : > { %s1736_s21 = smov %s1278_s24  ;;  %17 = sbr.rel (!%p15_p2) target bundleno = 3 (0x3), region = 75 }
 0x188   :  { %948 = vsyncpa [#allocation3], 1 }
 0x189   :  { %950 = vsyncpa [#allocation3 + $0x1], 1 }

</bundles_post_ra>
